<compile_context>
chip_gen: v6e
topology: v6e:2x2x1
jax: 0.10.0
libtpu: 0.0.40
codegen_flags: <defaults>
</compile_context>

<pallas_src>
import functools
import math

import jax
import jax.numpy as jnp
from jax.experimental import pallas as pl
from jax.experimental.pallas import tpu as pltpu


def _contrastive_kernel(bias_ref, rs_ref, x_ref, w_ref, o_ref, *, compute_dtype):
    # bias_ref: (1,) f32 scalar in SMEM.
    # rs_ref:   (1, K, 1) f32 = exp(logit_scale) / max(||w_k||, eps)
    # x_ref:    (1, C, tHW) native-dtype tile (channels on sublanes, HW on lanes)
    # w_ref:    (1, K, C)   resident across the HW-tile grid axis
    # o_ref:    (1, K, tHW) lane-dense output tile
    x = x_ref[0]                                       # (C, tHW) native dtype
    w = w_ref[0]                                       # (K, C)

    # Per-lane inverse norm of x over the channel (sublane) axis, in f32.
    # rsqrt(max(ss, eps^2)) == 1 / max(sqrt(ss), eps)  (sqrt is monotone).
    xf = x.astype(jnp.float32)
    eps2 = jnp.float32(1e-24)                          # (1e-12)^2, F.normalize eps
    x_ss = jnp.sum(xf * xf, axis=0, keepdims=True)     # (1, tHW)
    x_inv = jax.lax.rsqrt(jnp.maximum(x_ss, eps2))     # (1, tHW)

    # Unnormalized (K, C) @ (C, tHW) on the MXU with f32 accumulation.
    sim = jnp.dot(
        w.astype(compute_dtype),
        x.astype(compute_dtype),
        preferred_element_type=jnp.float32,
    )                                                  # (K, tHW)

    rs = rs_ref[0]                                     # (K, 1)
    o_ref[0] = (sim * x_inv * rs + bias_ref[0]).astype(o_ref.dtype)


def _choose_hw_tile(hw, target):
    """Lane-tile size: multiple of 128, capped by ceil(HW/128)*128 and target."""
    hw_ceil = ((hw + 127) // 128) * 128
    t = min(max(128, (target // 128) * 128), hw_ceil)
    return t


def contrastive_head(x, w, logit_scale, bias, *,
                     compute_dtype=jnp.float32,
                     out_dtype=jnp.float32,
                     hw_tile_target=2048):
    """x: (B, C, H, W), w: (B, K, C) -> (B, K, H, W).

    x / w are streamed at their native HBM dtype (pass bf16 x to halve the
    dominant HBM read); compute_dtype sets the MXU operand dtype only.
    """
    B, C, H, W = x.shape
    _, K, _ = w.shape
    HW = H * W

    # Pure reshape of contiguous NCHW -> (B, C, HW).  No astype, no pad.
    x_k = x.reshape(B, C, HW)

    # Per-row scale for the deferred normalization, computed once on the tiny
    # w tensor: exp(logit_scale) / max(||w_k||, eps).
    eps = jnp.float32(1e-12)
    w_f32 = w.astype(jnp.float32)
    w_norm = jnp.sqrt(jnp.sum(w_f32 * w_f32, axis=-1, keepdims=True))   # (B, K, 1)
    row_scale = (jnp.exp(jnp.asarray(logit_scale, jnp.float32))
                 / jnp.maximum(w_norm, eps)).astype(jnp.float32)        # (B, K, 1)

    bias_arr = jnp.reshape(jnp.asarray(bias, jnp.float32), (1,))

    tHW = _choose_hw_tile(HW, hw_tile_target)
    n_t = pl.cdiv(HW, tHW)

    # VMEM budget: double-buffered x / out / w tiles + f32 temporaries, with
    # headroom; floor 32 MiB (lifts v5e's 16 MiB default), cap 64 MiB (v7x).
    xb = jnp.dtype(x.dtype).itemsize
    wb = jnp.dtype(w.dtype).itemsize
    ob = jnp.dtype(out_dtype).itemsize
    est = (2 * C * tHW * xb + 2 * K * tHW * ob + 2 * K * C * wb
           + C * tHW * 4 + K * tHW * 4 + (4 << 20))
    vmem_limit = int(min(max(est, 32 << 20), 64 << 20))

    kernel = functools.partial(_contrastive_kernel, compute_dtype=compute_dtype)

    out = pl.pallas_call(
        kernel,
        out_shape=jax.ShapeDtypeStruct((B, K, HW), out_dtype),
        grid_spec=pltpu.PrefetchScalarGridSpec(
            num_scalar_prefetch=0,
            grid=(B, n_t),
            in_specs=[
                pl.BlockSpec(memory_space=pltpu.MemorySpace.SMEM),        # bias
                pl.BlockSpec((1, K, 1), lambda b, t: (b, 0, 0)),          # row scale
                pl.BlockSpec((1, C, tHW), lambda b, t: (b, 0, t)),        # x tile
                pl.BlockSpec((1, K, C), lambda b, t: (b, 0, 0)),          # w (resident)
            ],
            out_specs=pl.BlockSpec((1, K, tHW), lambda b, t: (b, 0, t)),
        ),
        compiler_params=pltpu.CompilerParams(
            dimension_semantics=("parallel", "parallel"),
            vmem_limit_bytes=vmem_limit,
        ),
    )(bias_arr, row_scale, x_k, w)

    # (B, K, HW) -> (B, K, H, W): reshape only, no slice / transpose.
    return out.reshape(B, K, H, W)


def _reference(x, w, logit_scale, bias):
    """Pure-JAX reference mirroring the PyTorch forward."""
    eps = 1e-12
    xn = x / jnp.maximum(jnp.sqrt(jnp.sum(x * x, axis=1, keepdims=True)), eps)
    wn = w / jnp.maximum(jnp.sqrt(jnp.sum(w * w, axis=-1, keepdims=True)), eps)
    sim = jnp.einsum('bchw,bkc->bkhw', xn, wn)
    return sim * jnp.exp(logit_scale) + bias


if __name__ == "__main__":
    key = jax.random.PRNGKey(0)
    k1, k2, k3, k4 = jax.random.split(key, 4)

    # Deterministic parameters, matching the module's __init__.
    bias = jnp.float32(-10.0)
    logit_scale = jnp.float32(math.log(1.0 / 0.07))

    # --- main test: small shapes consistent with the module ---
    B, C, H, W, K = 2, 32, 16, 16, 8
    x = jax.random.normal(k1, (B, C, H, W), dtype=jnp.float32)
    w = jax.random.normal(k2, (B, K, C), dtype=jnp.float32)

    out = jax.block_until_ready(contrastive_head(x, w, logit_scale, bias))
    ref = _reference(x, w, logit_scale, bias)
    assert out.shape == (B, K, H, W)
    assert jnp.allclose(out, ref, atol=1e-4, rtol=1e-4), (
        float(jnp.max(jnp.abs(out - ref)))
    )

    # --- ragged-HW path (H*W = 100 < 128-lane tile) + K not multiple of 8 ---
    B2, C2, H2, W2, K2 = 1, 48, 10, 10, 5
    x2 = jax.random.normal(k3, (B2, C2, H2, W2), dtype=jnp.float32)
    w2 = jax.random.normal(k4, (B2, K2, C2), dtype=jnp.float32)
    out2 = jax.block_until_ready(contrastive_head(x2, w2, logit_scale, bias))
    ref2 = _reference(x2, w2, logit_scale, bias)
    assert out2.shape == (B2, K2, H2, W2)
    assert jnp.allclose(out2, ref2, atol=1e-4, rtol=1e-4), (
        float(jnp.max(jnp.abs(out2 - ref2)))
    )

    # --- bf16-streamed x + bf16 MXU operands (the HBM-halving path) ---
    out_bf = jax.block_until_ready(
        contrastive_head(x.astype(jnp.bfloat16), w, logit_scale, bias,
                         compute_dtype=jnp.bfloat16)
    )
    assert jnp.allclose(out_bf, ref, atol=2e-1), (
        float(jnp.max(jnp.abs(out_bf - ref)))
    )

    print("KERNEL_OK")
</pallas_src>

<mosaic_0001>
module attributes {stable_mosaic.version = 11 : i64} {
  func.func @_contrastive_kernel(%arg0: i32, %arg1: i32, %arg2: memref<1xf32, #tpu.memory_space<smem>>, %arg3: memref<1x8x1xf32, #tpu.memory_space<vmem>>, %arg4: memref<1x32x256xf32, #tpu.memory_space<vmem>>, %arg5: memref<1x8x32xf32, #tpu.memory_space<vmem>>, %arg6: memref<1x8x256xf32, #tpu.memory_space<vmem>>) attributes {dimension_semantics = [#tpu.dimension_semantics<parallel>, #tpu.dimension_semantics<parallel>], iteration_bounds = array<i64: 2, 1>, scalar_prefetch = 0 : i64, scratch_operands = 0 : i64, tpu.core_type = #tpu.core_type<tc>, window_params = [{transform_indices = @transform_0, window_bounds = array<i64: 1>}, {transform_indices = @transform_1, window_bounds = array<i64: 1, 8, 1>}, {transform_indices = @transform_2, window_bounds = array<i64: 1, 32, 256>}, {transform_indices = @transform_3, window_bounds = array<i64: 1, 8, 32>}, {transform_indices = @transform_4, window_bounds = array<i64: 1, 8, 256>}]} {
    %c0 = arith.constant 0 : index
    %c0_0 = arith.constant 0 : index
    %c0_1 = arith.constant 0 : index
    %0 = vector.load %arg4[%c0, %c0_0, %c0_1] : memref<1x32x256xf32, #tpu.memory_space<vmem>>, vector<1x32x256xf32>
    %1 = vector.shape_cast %0 : vector<1x32x256xf32> to vector<32x256xf32>
    %c0_2 = arith.constant 0 : index
    %c0_3 = arith.constant 0 : index
    %c0_4 = arith.constant 0 : index
    %2 = vector.load %arg5[%c0_2, %c0_3, %c0_4] : memref<1x8x32xf32, #tpu.memory_space<vmem>>, vector<1x8x32xf32>
    %3 = vector.shape_cast %2 : vector<1x8x32xf32> to vector<8x32xf32>
    %4 = arith.mulf %1, %1 : vector<32x256xf32>
    %cst = arith.constant dense<0.000000e+00> : vector<256xf32>
    %5 = vector.multi_reduction <add>, %4, %cst [0] : vector<32x256xf32> to vector<256xf32>
    %6 = vector.shape_cast %5 : vector<256xf32> to vector<1x256xf32>
    %cst_5 = arith.constant 1.000000e-24 : f32
    %7 = vector.broadcast %cst_5 : f32 to vector<1x256xf32>
    %8 = arith.maximumf %6, %7 : vector<1x256xf32>
    %9 = math.rsqrt %8 : vector<1x256xf32>
    %cst_6 = arith.constant dense<0.000000e+00> : vector<8x256xf32>
    %10 = tpu.matmul %3, %1, %cst_6 {dimension_numbers = #tpu.dot_dimension_numbers<[1], [0], [0], [1], [0, 0, 1, 1], [], []>} : vector<8x32xf32>, vector<32x256xf32>, vector<8x256xf32> -> vector<8x256xf32>
    %c0_7 = arith.constant 0 : index
    %c0_8 = arith.constant 0 : index
    %c0_9 = arith.constant 0 : index
    %11 = vector.load %arg3[%c0_7, %c0_8, %c0_9] : memref<1x8x1xf32, #tpu.memory_space<vmem>>, vector<1x8x1xf32>
    %12 = vector.shape_cast %11 : vector<1x8x1xf32> to vector<8x1xf32>
    %13 = vector.broadcast %9 : vector<1x256xf32> to vector<8x256xf32>
    %14 = arith.mulf %10, %13 : vector<8x256xf32>
    %15 = vector.broadcast %12 : vector<8x1xf32> to vector<8x256xf32>
    %16 = arith.mulf %14, %15 : vector<8x256xf32>
    %c0_10 = arith.constant 0 : index
    %17 = memref.load %arg2[%c0_10] : memref<1xf32, #tpu.memory_space<smem>>
    %18 = vector.broadcast %17 : f32 to vector<8x256xf32>
    %19 = arith.addf %16, %18 : vector<8x256xf32>
    %c0_11 = arith.constant 0 : index
    %c0_12 = arith.constant 0 : index
    %c0_13 = arith.constant 0 : index
    %20 = vector.load %arg6[%c0_11, %c0_12, %c0_13] : memref<1x8x256xf32, #tpu.memory_space<vmem>>, vector<1x8x256xf32>
    %21 = vector.shape_cast %20 : vector<1x8x256xf32> to vector<8x256xf32>
    %22 = vector.shape_cast %19 : vector<8x256xf32> to vector<1x8x256xf32>
    tpu.vector_store %arg6[%c0_11, %c0_12, %c0_13], %22 {strides = array<i32>} : memref<1x8x256xf32, #tpu.memory_space<vmem>>, vector<1x8x256xf32>,
    return
  }
  func.func @transform_0(%arg0: i32, %arg1: i32) -> i32 {
    %c0_i32 = arith.constant 0 : i32
    %c0_i32_0 = arith.constant 0 : i32
    return %c0_i32 : i32
  }
  func.func @transform_1(%arg0: i32, %arg1: i32) -> (i32, i32, i32) {
    %c0_i32 = arith.constant 0 : i32
    %c0_i32_0 = arith.constant 0 : i32
    %c0_i32_1 = arith.constant 0 : i32
    return %arg0, %c0_i32, %c0_i32_0 : i32, i32, i32
  }
  func.func @transform_2(%arg0: i32, %arg1: i32) -> (i32, i32, i32) {
    %c0_i32 = arith.constant 0 : i32
    %c0_i32_0 = arith.constant 0 : i32
    return %arg0, %c0_i32, %arg1 : i32, i32, i32
  }
  func.func @transform_3(%arg0: i32, %arg1: i32) -> (i32, i32, i32) {
    %c0_i32 = arith.constant 0 : i32
    %c0_i32_0 = arith.constant 0 : i32
    %c0_i32_1 = arith.constant 0 : i32
    return %arg0, %c0_i32, %c0_i32_0 : i32, i32, i32
  }
  func.func @transform_4(%arg0: i32, %arg1: i32) -> (i32, i32, i32) {
    %c0_i32 = arith.constant 0 : i32
    %c0_i32_0 = arith.constant 0 : i32
    return %arg0, %c0_i32, %arg1 : i32, i32, i32
  }
}

</mosaic_0001>

<bundles_post_ra>
// kernel: tpu_custom_call.1
= control target key start
LH: loop header
LB: loop body
LE: loop exit
PB: predicated region body
PF: predicated region fallthrough
CT: control target
= control target key end

     0   :  { %s902_s0 = inlined_call_operand.<no memory space> [shape: f32[1], index: 0, kind: input, shape index: {}]   ;;  %s903_s1 = inlined_call_operand.vmem [shape: f32[2,8,1], index: 1, kind: input, shape index: {}]   ;;  %s904_s2 = inlined_call_operand.hbm [shape: f32[2,32,256], index: 2, kind: input, shape index: {}]   ;;  %s905_s3 = inlined_call_operand.vmem [shape: f32[2,8,32], index: 3, kind: input, shape index: {}]   ;;  %s906_s4 = inlined_call_operand.hbm [shape: f32[2,8,256], index: 4, kind: output, shape index: {}]  }
   0x1   :  { %9 = sst [smem:[#allocation2]] %s902_s0 }
   0x2   :  { %10 = vsyncpa [#allocation4], 0 }
   0x3   :  { %12 = vsyncpa [#allocation4 + $0x1], 0 }
   0x4   :  { %13 = vsyncpa [#allocation5], 0 }
   0x5   :  { %15 = vsyncpa [#allocation5 + $0x1], 0  ;;  %s761_s17 = smov 0   ;;  %s763_s18 = smov 0  }
   0x6   :  { %s765_s19 = smov 0   ;;  %s767_s20 = smov 0  }
   0x7   :  { %s769_s21 = smov 0   ;;  %s771_s22 = smov 0  }
   0x8 LB: > { %s526_s0 = sadd.s32 4294967295, %s725_s22   ;;  %s527_s23 = sadd.s32 4294967294, %s725_s22   ;;  %s725_s22 = sphi %s771_s22, %s21_s22   ;;  %s721_s21 = sphi %s769_s21, %s917_s21   ;;  %s717_s20 = sphi %s767_s20, %s916_s20   ;;  %s713_s19 = sphi %s765_s19, %s915_s19   ;;  %s709_s18 = sphi %s763_s18, %s914_s18   ;;  %s705_s17 = sphi %s761_s17, %s913_s17  }
   0x9   : > { %s33_s24 = sadd.s32 1, %s721_s21  ;;  %s89_s25 = sadd.s32 1, %s713_s19 }
   0xa   : > { %p35_p0 = scmp.ge.s32.totalorder %s33_s24, 2  ;;  %p96_p1 = scmp.ne.s32.totalorder %s713_s19, %s709_s18 }
   0xb   : > { %p97_p2 = scmp.eq.s32.totalorder %s725_s22, 0  ;;  %p102_p3 = scmp.ne.s32.totalorder %s709_s18, %s705_s17 }
   0xc   : > { %s919_s24 = smov (%p35_p0, %s33_s24), 0  ;;  %p103_p5 = scmp.eq.s32.totalorder %s526_s0, 0 }
   0xd   : > { %p802_p4 = por %p97_p2, %p96_p1  ;;  %s84_s27 = ssub.s32 %s721_s21, %s919_s24 }
   0xe   : > { %p154_p6 = scmp.eq.s32.totalorder %s526_s0, 1  ;;  %p87_p7 = scmp.eq.s32.totalorder %s84_s27, 0 }
   0xf   : > { %p808_p8 = por %p103_p5, %p102_p3  ;;  %p160_p10 = scmp.eq.s32.totalorder %s527_s23, 1 }
  0x10   : > { %p812_p9 = por %p154_p6, %p96_p1  ;;  %p558_p13 = scmp.lt.s32.totalorder %s725_s22, 2 }
  0x11   : > { %s817_s30 = scalar_select %p87_p7, %s713_s19, %s89_s25  }
  0x12   : > { %p819_p11 = por %p160_p10, %p102_p3  ;;  %s190_s6 = sand.u32 1, %s713_s19  }
  0x13   : > { %s530_s7 = sshll.u32 %s190_s6, 6  ;;  %s544_s8 = sshll.u32 %s721_s21, 10 }
  0x14   : > { %s202_s11 = scalar_lea.hbm %s904_s2, %s544_s8  ;;  %s194_s12 = scalar_lea.vmem [#allocation3], %s530_s7 }
  0x15   : > { %s203_s13 = sshll.u32 %s194_s12, 4  ;;  %p832_p0 = pnand %p558_p13, %p802_p4  ;;  %s204_s13 = int_to_ptr.vmem [resolvable:$true] %s203_s13 }
  0x16   : > { %p533_p1 = scmp.ge.s32.totalorder %s725_s22, 1  ;;  %s191_s15 = scalar_lea.sflag [#allocation4], %s190_s6 }
  0x17   : > { %p619_p2 = pneg %p832_p0  ;;  %s630_s16 = scalar_lea.vmem %s204_s13, 1024 }
  0x18   : > { %p631_p3 = scmp.ne.s32.totalorder %s204_s13, %s630_s16  ;;  %s727_s0 = smov [#allocation3]  }
  0x19   : > { %s635_s23 = sshll.u32 %s727_s0, 4  ;;  %s636_s23 = int_to_ptr.vmem [resolvable:$false] %s635_s23 }
  0x1a   : > { %p633_p5 = pnand %p631_p3, %p619_p2  ;;  %s637_s25 = scalar_lea.vmem %s636_s23, 2048 }
  0x1b   : > { %p638_p7 = scmp.lt.s32.totalorder %s204_s13, %s636_s23  ;;  %p639_p10 = scmp.lt.s32.totalorder %s637_s25, %s630_s16 }
  0x1c   : > { %p634_p6 = pneg %p633_p5 }
  0x1d   : > { %p640_p12 = por %p639_p10, %p638_p7 }
  0x1f   : > { %p641_p4 = pnand %p640_p12, %p634_p6 }
  0x21   : > { %644 = shalt.err (!%p641_p4)
}
  0x22   : > { %s728_s26 = smov 256   ;;  %s729_s27 = smov 16  }
  0x23   : > { %553 = dma.hbm_to_vmem [thread:$0]  (!%p832_p0), %s202_s11, 1024, %s204_s13, %s191_s15, %s728_s26, %s728_s26, %s729_s27  }
  0x24   : > { %p218_p13 = scmp.lt.s32.totalorder %s725_s22, 3 }
  0x26   : > { %p219_p2 = pnand %p533_p1, %p218_p13 }
  0x27   : > { %s845_s6 = sand.u32 (!%p219_p2), 1, %s709_s18  }
  0x28   : > { %222 = sbr.rel (%p219_p2) target bundleno = 270 (0x10e), region = 36  ;;  %s534_s7 = sshll.u32 (!%p219_p2), %s845_s6, 6 }
  0x29   : > { %s225_s8 = scalar_lea.sflag (!%p219_p2), [#allocation4], %s845_s6  ;;  %s228_s9 = scalar_lea.vmem (!%p219_p2), [#allocation3], %s534_s7 }
  0x2d   : > { %696 = dma.done.wait (%p808_p8), %s225_s8, 1024  }
  0x2e   : > { %698 = vsyncadd (%p808_p8), %s225_s8, 4294966272  ;;  %p261_p12 = scmp.lt.s32.totalorder %s717_s20, 1  ;;  %v730_v0 = vmov 0.0   ;;  %v731_v1 = vmov 0   ;;  %v278_v2 = vld [vmem:[%s228_s9 + $0x38] sm:$0xff]  ;;  %v277_v3 = vld [vmem:[%s228_s9 + $0x30] sm:$0xff] }
  0x2f   : > { %378 = vmatprep.mubr.f32.mxu0 %v730_v0  ;;  %612 = vset.pattern.permute.xlu0 %v731_v1  ;;  %v276_v4 = vld [vmem:[%s228_s9 + $0x28] sm:$0xff]  ;;  %v275_v5 = vld [vmem:[%s228_s9 + $0x20] sm:$0xff]  ;;  %v274_v6 = vld [vmem:[%s228_s9 + $0x18] sm:$0xff]  ;;  %v287_v17 = vmul.f32 %v278_v2, %v278_v2  ;;  %v286_v18 = vmul.f32 %v277_v3, %v277_v3  ;;  %vm310_vm0 = vcmask 261120   ;;  %s395_s0 = sld [smem:[#allocation2]]  ;;  %s535_s23 = sshll.u32 %s845_s6, 4 }
  0x30   : > { %s262_s10 = scalar_select %p261_p12, %s717_s20, 1  ;;  %338 = vmatprep.subr.mxu0 %v278_v2  ;;  %v273_v7 = vld [vmem:[%s228_s9 + $0x10] sm:$0xff]  ;;  %v283_v8 = vmul.f32 %v274_v6, %v274_v6  ;;  %v272_v10 = vld [vmem:[%s228_s9 + $0x8] sm:$0xff]  ;;  %v271_v11 = vld [vmem:[%s228_s9] sm:$0xff]  ;;  %v285_v12 = vmul.f32 %v276_v4, %v276_v4  ;;  %v284_v13 = vmul.f32 %v275_v5, %v275_v5 }
  0x31   : > { %339 = vmatpush1.msra.mxu0 %v277_v3  ;;  %v282_v9 = vmul.f32 %v273_v7, %v273_v7  ;;  %v281_v14 = vmul.f32 %v272_v10, %v272_v10  ;;  %v280_v15 = vmul.f32 %v271_v11, %v271_v11  ;;  %s545_s25 = sshll.u32 %s717_s20, 8  ;;  %s260_s26 = scalar_lea.vmem [#allocation6], %s535_s23 }
  0x32   : > { %s536_s11 = sshll.u32 %s262_s10, 3  ;;  %340 = vmatprep.subr.mxu0 %v276_v4  ;;  %s418_s27 = sshll.u32 %s260_s26, 4  ;;  %s419_s27 = int_to_ptr.vmem [resolvable:$true] %s418_s27 }
  0x33   : > { %s264_s14 = scalar_lea.vmem %s903_s1, %s536_s11  ;;  %s269_s16 = scalar_lea.vmem %s905_s3, %s536_s11  ;;  %341 = vmatpush1.msra.mxu0 %v275_v5  ;;  %v297_v19 = vadd.f32 %v283_v8, %v281_v14  ;;  %v288_v20 = vadd.f32 %v282_v9, %v280_v15 }
  0x34   : > { %v385_v16 = vld [vmem:[%s264_s14] sm:$0xff]  ;;  %342 = vmatprep.subr.mxu0 %v274_v6  ;;  %s416_s9 = scalar_lea.hbm %s906_s4, %s545_s25  ;;  %s402_s10 = scalar_lea.sflag [#allocation5], %s845_s6 }
  0x35   : > { %390 = vperm.xlu0 %612, %v385_v16   ;;  %343 = vmatpush1.msra.mxu0 %v273_v7  ;;  %v279_v21 = vld [vmem:[%s269_s16] sm:$0xff]  ;;  %v298_v22 = vadd.f32 %v297_v19, %v285_v12  ;;  %v289_v23 = vadd.f32 %v288_v20, %v284_v13  ;;  %v396_v45 = vstv %s395_s0  ;;  %s645_s11 = scalar_lea.vmem %s419_s27, 256  ;;  %s732_s12 = smov [#allocation6]  }
  0x36   : > { %344 = vmatprep.subr.mxu0 %v272_v10  ;;  %p646_p8 = scmp.ne.s32.totalorder %s419_s27, %s645_s11  ;;  %s649_s20 = sshll.u32 %s732_s12, 4  ;;  %s650_s20 = int_to_ptr.vmem [resolvable:$false] %s649_s20 }
  0x37   : > { %345 = vmatpush1.msra.mxu0 %v271_v11  ;;  %v299_v24 = vadd.f32 %v298_v22, %v287_v17  ;;  %v290_v25 = vadd.f32 %v289_v23, %v286_v18  ;;  %s651_s13 = scalar_lea.vmem %s650_s20, 512  ;;  %p652_p3 = scmp.lt.s32.totalorder %s419_s27, %s650_s20 }
  0x38   : > { %538 = vmatmul.mubr.msk.f32.vlgmr.msra.gmra.mxu0 %vm310_vm0, %v279_v21  ;;  %p647_p0 = pnand %p646_p8, %p812_p9  ;;  %p653_p5 = scmp.lt.s32.totalorder %s651_s13, %s645_s11 }
  0x39   : > { %v291_v26 = vrot.slane %v290_v25, 4  ;;  %v300_v27 = vrot.slane %v299_v24, 4 }
  0x3a   : > { %p648_p1 = pneg %p647_p0  ;;  %p654_p6 = por %p653_p5, %p652_p3 }
  0x3b   : > { %v292_v28 = vadd.f32 %v291_v26, %v290_v25  ;;  %v301_v29 = vadd.f32 %v300_v27, %v299_v24 }
  0x3c   : > { %p655_p7 = pnand %p654_p6, %p648_p1 }
  0x3d   : > { %v293_v30 = vrot.slane %v292_v28, 2  ;;  %v302_v31 = vrot.slane %v301_v29, 2 }
  0x3f   : > { %v294_v32 = vadd.f32 %v293_v30, %v292_v28  ;;  %v303_v33 = vadd.f32 %v302_v31, %v301_v29 }
  0x41   : > { %v295_v34 = vrot.slane %v294_v32, 1  ;;  %v304_v35 = vrot.slane %v303_v33, 1 }
  0x43   : > { %v296_v36 = vadd.f32 %v295_v34, %v294_v32  ;;  %v305_v37 = vadd.f32 %v304_v35, %v303_v33 }
  0x45   : > { %v306_v38 = vmax.f32 %v296_v36, 1e-24  ;;  %v307_v39 = vmax.f32 %v305_v37, 1e-24 }
  0x47   : > { %613 = vrsqrt.f32 %v306_v38 }
  0x48   : > { %615 = vrsqrt.f32 %v307_v39 }
  0x54   : > { %v614_v40 = vpop.eup %613 }
  0x55   : > { %v616_v41 = vpop.eup %615 }
  0xb0   : > { %v391_v43 = vpop.permute.xlu0 %390 }
  0xf8   : > { %v380_v42 = vpop.f32.mrf.mxu0 }
  0xf9   : > { %v386_v44 = vmul.f32 %v614_v40, %v380_v42 }
  0xfa   : > { %v382_v46 = vpop.f32.mrf.mxu0 }
  0xfb   : > { %v393_v47 = vmul.f32 %v391_v43, %v386_v44  ;;  %v387_v48 = vmul.f32 %v616_v41, %v382_v46 }
  0xfd   : > { %v397_v49 = vadd.f32 %v396_v45, %v393_v47  ;;  %v394_v50 = vmul.f32 %v391_v43, %v387_v48 }
  0xff   : > { %399 = vst [vmem:[%s260_s26] sm:$0xff] %v397_v49  ;;  %v398_v51 = vadd.f32 %v396_v45, %v394_v50 }
 0x101   : > { %400 = vst [vmem:[%s260_s26 + $0x8] sm:$0xff] %v398_v51 }
 0x102   : > { %658 = shalt.err (!%p655_p7)
}
 0x103   : > { %s659_s14 = scalar_lea.hbm %s416_s9, 256  ;;  %s663_s15 = scalar_lea.hbm %s906_s4, 512 }
 0x104   : > { %p660_p10 = scmp.ne.s32.totalorder %s416_s9, %s659_s14  ;;  %p664_p2 = scmp.lt.s32.totalorder %s416_s9, %s906_s4 }
 0x105   : > { %p665_p12 = scmp.lt.s32.totalorder %s663_s15, %s659_s14 }
 0x106   : > { %p661_p4 = pnand %p660_p10, %p812_p9 }
 0x107   : > { %p666_p8 = por %p665_p12, %p664_p2 }
 0x108   : > { %p662_p13 = pneg %p661_p4 }
 0x10a   : > { %p667_p0 = pnand %p666_p8, %p662_p13 }
 0x10c   : > { %670 = shalt.err (!%p667_p0)
}
 0x10d   : > { %548 = dma.vmem_to_hbm [thread:$0]  (%p812_p9), %s419_s27, 256, %s416_s9, %s402_s10  }
 0x10e PF: > { %s430_s23 = sand.u32 1, %s705_s17   ;;  %p912_p1 = scmp.ge.s32.totalorder %s725_s22, 2 }
 0x10f   : > { %s431_s25 = scalar_lea.sflag [#allocation5], %s430_s23 }
 0x110   : > { %p555_p3 = pnand %p912_p1, %p819_p11 }
 0x112   : > { %p556_p5 = pneg %p555_p3 }
 0x114   : > { %700 = dma.done.wait (%p556_p5), %s431_s25, 256  }
 0x115   : > { %702 = vsyncadd (%p556_p5), %s431_s25, 4294967040  ;;  %s21_s22 = sadd.s32 1, %s725_s22   ;;  %s913_s17 = smov %s709_s18 }
 0x116   : > { %p18_p6 = scmp.ge.s32.totalorder %s21_s22, 4   ;;  %s914_s18 = smov %s713_s19 }
 0x117   : > { %s915_s19 = smov %s817_s30  ;;  %s916_s20 = smov %s721_s21 }
 0x118   : > { %s917_s21 = smov %s919_s24  ;;  %20 = sbr.rel (!%p18_p6) target bundleno = 8 (0x8), region = 87 }
 0x11d   :  { %436 = vsyncpa [#allocation4], 1 }
 0x11e   :  { %438 = vsyncpa [#allocation4 + $0x1], 1 }
 0x11f   :  { %439 = vsyncpa [#allocation5], 1 }
 0x120   :  { %441 = vsyncpa [#allocation5 + $0x1], 1 }

</bundles_post_ra>
